<compile_context>
chip_gen: v5e
topology: v5e:2x2
jax: 0.10.0
libtpu: 0.0.40
codegen_flags: <defaults>
</compile_context>

<pallas_src>
import functools

import jax
import jax.numpy as jnp
from jax.experimental import pallas as pl
from jax.experimental.pallas import tpu as pltpu


_LANE = 128                     # TPU lane width (last block dim)
_TILE_BYTES = 4 * 1024 * 1024   # ~4 MiB blocks: good on v5e/v6e, VMEM-safe on v7x


def _sublane_quantum(dtype):
    # f32 -> 8, bf16 -> 16, int8/fp8 -> 32 (sub-32-bit dtypes pack along sublanes).
    return max(8, 32 // jnp.dtype(dtype).itemsize)


def _pick_compute_dtype(x_dtype):
    x_dtype = jnp.dtype(x_dtype)
    if x_dtype == jnp.float32:
        return jnp.float32
    if x_dtype == jnp.bfloat16:
        kind = ""
        try:
            kind = jax.devices()[0].device_kind.lower()
        except Exception:
            pass
        # v5e's VPU has no native bf16 arithmetic -> upcast there only.
        if "v5 lite" in kind or "v5e" in kind:
            return jnp.float32
        return jnp.bfloat16
    return jnp.float32


def _actnorm_kernel(bias_ref, scale_ref, x_ref, o_ref, *, compute_dtype):
    """One (row-tile, lane-tile) block: out = (x + bias[row]) * scale[row]."""
    b = bias_ref[...].astype(compute_dtype)    # (r_tile, 1): broadcast along lanes
    s = scale_ref[...].astype(compute_dtype)   # (r_tile, 1): exp(logs), precomputed
    x = x_ref[...].astype(compute_dtype)       # (r_tile, l_tile)
    o_ref[...] = ((x + b) * s).astype(o_ref.dtype)


def _choose_tiles(nc, hw, itemsize, quantum):
    """Pick (r_tile, l_tile) for an (nc, hw) row-major elementwise stream."""
    # Lane dim: full extent unless HW is lane-aligned and a quantum-row block
    # would blow past the tile budget; in that case tile it in 128-lane units.
    if hw % _LANE == 0 and hw * itemsize * quantum > _TILE_BYTES:
        l_tile = max(_LANE, (_TILE_BYTES // (quantum * itemsize)) // _LANE * _LANE)
        l_tile = min(l_tile, hw)
    else:
        l_tile = hw
    # Row dim: as many (n, c) rows as fit the budget, rounded to the sublane
    # quantum; fall back to full extent (always a legal block dim) if all fit.
    rows_fit = _TILE_BYTES // (l_tile * itemsize)
    if rows_fit >= nc:
        r_tile = nc
    else:
        r_tile = min(max(quantum, rows_fit // quantum * quantum), nc)
    return r_tile, l_tile


def actnorm_forward(x_nchw, bias, logs, *, donate_x=False):
    """ActNorm forward (reverse=False). x_nchw: (N, C, H, W); bias/logs: (1, C, 1, 1)."""
    N, C, H, W = x_nchw.shape
    NC, HW = N * C, H * W
    dtype = x_nchw.dtype
    itemsize = jnp.dtype(dtype).itemsize
    compute_dtype = _pick_compute_dtype(dtype)
    quantum = _sublane_quantum(dtype)

    # Per-row (= per (n, c)) parameters; exp(logs) hoisted out of the kernel.
    bias_c = bias.reshape(C).astype(jnp.float32)
    scale_c = jnp.exp(logs.reshape(C).astype(jnp.float32))
    bias_row = jnp.tile(bias_c, N).reshape(NC, 1)     # tiny: N*C f32 scalars
    scale_row = jnp.tile(scale_c, N).reshape(NC, 1)

    # One contiguous row per (n, c): free reshape, no pad, no extra HBM pass.
    x2 = x_nchw.reshape(NC, HW)

    r_tile, l_tile = _choose_tiles(NC, HW, itemsize, quantum)
    grid = (pl.cdiv(NC, r_tile), pl.cdiv(HW, l_tile))

    x_spec = pl.BlockSpec((r_tile, l_tile), lambda r, l: (r, l))
    p_spec = pl.BlockSpec((r_tile, 1), lambda r, l: (r, 0))

    # Scoped VMEM sized from the actual double-buffered in+out working set.
    block_bytes = r_tile * l_tile * itemsize
    param_bytes = 2 * r_tile * 4
    vmem_limit = int(min(max(2 * (2 * block_bytes + param_bytes) + (4 << 20),
                             16 << 20), 96 << 20))

    out2 = pl.pallas_call(
        functools.partial(_actnorm_kernel, compute_dtype=compute_dtype),
        out_shape=jax.ShapeDtypeStruct((NC, HW), dtype),
        grid_spec=pltpu.PrefetchScalarGridSpec(
            num_scalar_prefetch=0,
            grid=grid,
            in_specs=[p_spec, p_spec, x_spec],   # bias, scale, x
            out_specs=x_spec,
        ),
        compiler_params=pltpu.CompilerParams(
            dimension_semantics=("parallel", "parallel"),
            vmem_limit_bytes=vmem_limit,
        ),
        input_output_aliases=({2: 0} if donate_x else {}),
    )(bias_row, scale_row, x2)

    return out2.reshape(N, C, H, W)


if __name__ == "__main__":
    # Deterministic inputs / parameters (shapes follow the module's __init__:
    # bias, logs are (1, num_features, 1, 1); input is NCHW).
    N, C, H, W = 2, 4, 16, 16
    key = jax.random.PRNGKey(0)
    kx, kb, kl = jax.random.split(key, 3)

    x = jax.random.normal(kx, (N, C, H, W), dtype=jnp.float32)
    bias = 0.1 * jax.random.normal(kb, (1, C, 1, 1), dtype=jnp.float32)
    logs = 0.1 * jax.random.normal(kl, (1, C, 1, 1), dtype=jnp.float32)

    out = actnorm_forward(x, bias, logs)
    out = jax.block_until_ready(out)

    # Pure-JAX reference of the PyTorch forward (reverse=False, ldj=None).
    ref = (x + bias) * jnp.exp(logs)
    assert out.shape == (N, C, H, W)
    assert jnp.allclose(out, ref, atol=1e-5, rtol=1e-5)

    # TODO(synk): data-dependent initialize_parameters() only runs in training
    # mode; inference forward uses the stored bias/logs, implemented here.
    # TODO(synk): ldj / return_ldj path (sldj + logs.sum()*H*W) is a scalar
    # side-computation that belongs in the wrapper, not the streaming kernel.

    print("KERNEL_OK")
</pallas_src>

<mosaic_0001>
module attributes {stable_mosaic.version = 11 : i64} {
  func.func @_actnorm_kernel(%arg0: i32, %arg1: i32, %arg2: memref<8x1xf32, #tpu.memory_space<vmem>>, %arg3: memref<8x1xf32, #tpu.memory_space<vmem>>, %arg4: memref<8x256xf32, #tpu.memory_space<vmem>>, %arg5: memref<8x256xf32, #tpu.memory_space<vmem>>) attributes {dimension_semantics = [#tpu.dimension_semantics<parallel>, #tpu.dimension_semantics<parallel>], iteration_bounds = array<i64: 1, 1>, scalar_prefetch = 0 : i64, scratch_operands = 0 : i64, tpu.core_type = #tpu.core_type<tc>, window_params = [{transform_indices = @transform_0, window_bounds = array<i64: 8, 1>}, {transform_indices = @transform_1, window_bounds = array<i64: 8, 1>}, {transform_indices = @transform_2, window_bounds = array<i64: 8, 256>}, {transform_indices = @transform_3, window_bounds = array<i64: 8, 256>}]} {
    %c0 = arith.constant 0 : index
    %c0_0 = arith.constant 0 : index
    %0 = vector.load %arg2[%c0, %c0_0] : memref<8x1xf32, #tpu.memory_space<vmem>>, vector<8x1xf32>
    %c0_1 = arith.constant 0 : index
    %c0_2 = arith.constant 0 : index
    %1 = vector.load %arg3[%c0_1, %c0_2] : memref<8x1xf32, #tpu.memory_space<vmem>>, vector<8x1xf32>
    %c0_3 = arith.constant 0 : index
    %c0_4 = arith.constant 0 : index
    %2 = vector.load %arg4[%c0_3, %c0_4] : memref<8x256xf32, #tpu.memory_space<vmem>>, vector<8x256xf32>
    %3 = vector.broadcast %0 : vector<8x1xf32> to vector<8x256xf32>
    %4 = arith.addf %2, %3 : vector<8x256xf32>
    %5 = vector.broadcast %1 : vector<8x1xf32> to vector<8x256xf32>
    %6 = arith.mulf %4, %5 : vector<8x256xf32>
    %c0_5 = arith.constant 0 : index
    %c0_6 = arith.constant 0 : index
    %7 = vector.load %arg5[%c0_5, %c0_6] : memref<8x256xf32, #tpu.memory_space<vmem>>, vector<8x256xf32>
    tpu.vector_store %arg5[%c0_5, %c0_6], %6 {strides = array<i32>} : memref<8x256xf32, #tpu.memory_space<vmem>>, vector<8x256xf32>,
    return
  }
  func.func @transform_0(%arg0: i32, %arg1: i32) -> (i32, i32) {
    %c0_i32 = arith.constant 0 : i32
    %c0_i32_0 = arith.constant 0 : i32
    return %arg0, %c0_i32 : i32, i32
  }
  func.func @transform_1(%arg0: i32, %arg1: i32) -> (i32, i32) {
    %c0_i32 = arith.constant 0 : i32
    %c0_i32_0 = arith.constant 0 : i32
    return %arg0, %c0_i32 : i32, i32
  }
  func.func @transform_2(%arg0: i32, %arg1: i32) -> (i32, i32) {
    %c0_i32 = arith.constant 0 : i32
    return %arg0, %arg1 : i32, i32
  }
  func.func @transform_3(%arg0: i32, %arg1: i32) -> (i32, i32) {
    %c0_i32 = arith.constant 0 : i32
    return %arg0, %arg1 : i32, i32
  }
}

</mosaic_0001>

<bundles_post_ra>
// kernel: tpu_custom_call.1
= control target key start
LH: loop header
LB: loop body
LE: loop exit
PB: predicated region body
PF: predicated region fallthrough
CT: control target
= control target key end

     0   :  { %v80_v1 = vmov 0   ;;  %s117_s0 = inlined_call_operand.vmem [shape: f32[8,1], index: 0, kind: input, shape index: {}]   ;;  %s118_s1 = inlined_call_operand.vmem [shape: f32[8,1], index: 1, kind: input, shape index: {}]   ;;  %s119_s2 = inlined_call_operand.vmem [shape: f32[8,256], index: 2, kind: input, shape index: {}]   ;;  %s120_s3 = inlined_call_operand.hbm [shape: f32[8,256], index: 3, kind: output, shape index: {}]  }
   0x1   :  { %v15_v0 = vld [vmem:[%s117_s0] sm:$0xff]  ;;  %53 = vset.pattern.permute.xlu0 %v80_v1 }
   0x2   :  { %8 = vsyncpa [#allocation3], 0  ;;  %21 = vperm.xlu0 %53, %v15_v0   ;;  %v16_v2 = vld [vmem:[%s118_s1] sm:$0xff]  ;;  %v18_v5 = vld [vmem:[%s119_s2 + $0x8] sm:$0xff]  ;;  %s81_s0 = smov [#allocation2]   ;;  %s42_s23 = sshll.u32 %s120_s3, 4  ;;  %s43_s23 = int_to_ptr.hbm [resolvable:$true] %s42_s23 }
   0x3   :  { %v17_v4 = vld [vmem:[%s119_s2] sm:$0xff]  ;;  %s40_s20 = sshll.u32 %s81_s0, 4  ;;  %s41_s20 = int_to_ptr.vmem [resolvable:$true] %s40_s20 }
   0xa   :  { %28 = vperm.xlu0 %53, %v16_v2  }
  0x74   :  { %v22_v3 = vpop.permute.xlu0 %21 }
  0x75   :  { %v24_v6 = vadd.f32 %v22_v3, %v17_v4  ;;  %v25_v7 = vadd.f32 %v22_v3, %v18_v5 }
  0x7c   :  { %v29_v8 = vpop.permute.xlu0 %28 }
  0x7d   :  { %v31_v9 = vmul.f32 %v29_v8, %v24_v6  ;;  %v32_v10 = vmul.f32 %v29_v8, %v25_v7 }
  0x7f   :  { %33 = vst [vmem:[#allocation2] sm:$0xff] %v31_v9 }
  0x80   :  { %34 = vst [vmem:[#allocation2 + $0x8] sm:$0xff] %v32_v10 }
  0x81   :  { %45 = dma.vmem_to_hbm [thread:$0]  %s41_s20, 256, %s43_s23, [#allocation3]  }
  0x82   :  { %78 = dma.done.wait [#allocation3], 256  }
  0x83   :  { %79 = vsyncadd [#allocation3], 4294967040 }
  0x84   :  { %50 = vsyncpa [#allocation3], 1 }

</bundles_post_ra>
